<compile_context>
chip_gen: v7x
topology: tpu7x:2x2x1
jax: 0.10.0
libtpu: 0.0.40
codegen_flags: <defaults>
</compile_context>

<pallas_src>
import math

import jax
import jax.numpy as jnp
from jax.experimental import pallas as pl
from jax.experimental.pallas import tpu as pltpu


def _data_embedding_kernel(x_ref, w_ref, add_ref, o_ref):
    # x_ref:   (1, Rt, k*F)   packed input rows for this (row-tile, batch) step
    # w_ref:   (k*F, k*D)     block-diagonal value-embedding weight
    # add_ref: (Rt, k*D)      hoisted additive term: pe[t] + lap@Ws + bs + bv (packed)
    # o_ref:   (1, Rt, k*D)
    val = jnp.dot(x_ref[0], w_ref[...], preferred_element_type=jnp.float32)
    o_ref[0] = (val + add_ref[...].astype(jnp.float32)).astype(o_ref.dtype)


def _choose_row_tile(packed_rows, bytes_per_row, max_bytes=8 << 20):
    """Fixed large row tile (multiple of 8) targeting ~8 MiB of per-step traffic.
    Shape-independent: the grid uses pl.cdiv and Pallas masks the partial tail block."""
    if packed_rows * bytes_per_row <= max_bytes:
        return int(packed_rows)                      # single full-extent block
    tile = (max_bytes // bytes_per_row) // 8 * 8
    return int(max(8, min(tile, packed_rows)))


def data_embedding_forward(x, lap_mx, Wv, bv, Ws, bs, pe_table, out_dtype=None):
    """x: (B, T, N, >=F); lap_mx: (N, L); Wv: (F, D); pe_table: (>=T, D).

    Returns (B, T, N, D), matching DataEmbedding.forward with
    add_time_in_day=False, add_day_in_week=False, drop=0.0.
    """
    B, T, N, _ = x.shape
    F, D = Wv.shape
    assert pe_table.shape[0] >= T, "positional-encoding table shorter than sequence"
    in_dtype = x.dtype
    out_dtype = in_dtype if out_dtype is None else out_dtype
    rows = T * N

    # Lane-packing factor: pack k consecutive (t, n) rows into the lane dimension so the
    # stored tile's last dim is a multiple of 128.  Pad rows to a multiple of k if needed.
    k = (128 // D) if (D < 128 and 128 % D == 0) else 1
    pad = (-rows) % k
    rows_p = rows + pad
    packed_rows = rows_p // k
    kF, kD = k * F, k * D

    # ---- hoisted loop-invariant additive term (tiny, computed once in the wrapper) ----
    spat = lap_mx.astype(jnp.float32) @ Ws.astype(jnp.float32) + bs.astype(jnp.float32)
    add = (pe_table[:T].astype(jnp.float32)[:, None, :]        # (T, 1, D)
           + spat[None, :, :]                                   # (1, N, D)
           + bv.astype(jnp.float32)[None, None, :])             # (1, 1, D)
    add_flat = add.astype(in_dtype).reshape(rows, D)
    if pad:
        add_flat = jnp.pad(add_flat, ((0, pad), (0, 0)))
    add_packed = add_flat.reshape(packed_rows, kD)

    # Block-diagonal weight so k rows' outputs land side-by-side in the lane dim.
    W_wide = jnp.zeros((kF, kD), dtype=jnp.float32)
    for j in range(k):
        W_wide = W_wide.at[j * F:(j + 1) * F, j * D:(j + 1) * D].set(
            Wv.astype(jnp.float32))
    W_wide = W_wide.astype(in_dtype)

    # Faithful to origin_x[:, :, :, :feature_dim]; keep native dtype (no f32 up-cast).
    x_flat = x[..., :F].reshape(B, rows, F)
    if pad:
        x_flat = jnp.pad(x_flat, ((0, 0), (0, pad), (0, 0)))
    x_packed = x_flat.reshape(B, packed_rows, kF)

    it_in = jnp.dtype(in_dtype).itemsize
    it_out = jnp.dtype(out_dtype).itemsize
    bytes_per_row = it_in * (kF + kD) + it_out * kD              # x + add + out per step
    row_tile = _choose_row_tile(packed_rows, bytes_per_row)
    num_row_tiles = pl.cdiv(packed_rows, row_tile)

    out_packed = pl.pallas_call(
        _data_embedding_kernel,
        out_shape=jax.ShapeDtypeStruct((B, packed_rows, kD), out_dtype),
        grid_spec=pltpu.PrefetchScalarGridSpec(
            num_scalar_prefetch=0,
            # Row-tile axis outermost, batch innermost: `add_packed`'s block index (r, 0)
            # is unchanged across the inner b-loop, so it stays resident in VMEM.
            grid=(num_row_tiles, B),
            in_specs=[
                pl.BlockSpec((1, row_tile, kF), lambda r, b: (b, r, 0)),  # x tile
                pl.BlockSpec((kF, kD), lambda r, b: (0, 0)),              # W_wide
                pl.BlockSpec((row_tile, kD), lambda r, b: (r, 0)),        # add term
            ],
            out_specs=pl.BlockSpec((1, row_tile, kD), lambda r, b: (b, r, 0)),
        ),
        compiler_params=pltpu.CompilerParams(
            # Shard the (leading) row-tile axis across TensorCores on v7x; keep batch
            # inner/serial so each core reuses its resident add block.
            dimension_semantics=("parallel", "arbitrary"),
            # Large double-buffered blocks need the scoped-VMEM limit raised explicitly
            # (v5e default is 16 MiB); 48 MiB stays inside v7x's 64 MiB physical VMEM.
            vmem_limit_bytes=48 << 20,
        ),
    )(x_packed, W_wide, add_packed)

    # Contiguous (free) reshape back to the PyTorch output layout; trim row padding.
    return out_packed.reshape(B, rows_p, D)[:, :rows].reshape(B, T, N, D)


def make_positional_encoding(embed_dim, max_len=100):
    """Matches the PyTorch PositionalEncoding buffer construction (even embed_dim)."""
    position = jnp.arange(0, max_len, dtype=jnp.float32)[:, None]
    div_term = jnp.exp(jnp.arange(0, embed_dim, 2, dtype=jnp.float32)
                       * -(math.log(10000.0) / embed_dim))
    pe = jnp.zeros((max_len, embed_dim), dtype=jnp.float32)
    pe = pe.at[:, 0::2].set(jnp.sin(position * div_term))
    pe = pe.at[:, 1::2].set(jnp.cos(position * div_term))
    return pe


def reference_forward(x, lap_mx, Wv, bv, Ws, bs, pe_table):
    """Pure-JAX reference mirroring the PyTorch forward."""
    B, T, N, F = x.shape
    val = jnp.einsum("btnf,fd->btnd", x, Wv) + bv
    pos = pe_table[:T][None, :, None, :]
    spat = (lap_mx @ Ws + bs)[None, None, :, :]
    return val + pos + spat


# TODO(synk): add_time_in_day / add_day_in_week embedding lookups are not implemented
# (module defaults are False); dropout with p=0.0 is the identity and is omitted.

if __name__ == "__main__":
    B, T, N = 2, 8, 16
    feature_dim = 4
    embed_dim = 32
    lape_dim = 8

    key = jax.random.PRNGKey(0)
    k_x, k_lap, k_wv, k_bv, k_ws, k_bs = jax.random.split(key, 6)

    x = jax.random.normal(k_x, (B, T, N, feature_dim), dtype=jnp.float32)
    lap_mx = jax.random.normal(k_lap, (N, lape_dim), dtype=jnp.float32)

    # Parameters stored as (in, out) for right-multiplication.
    Wv = jax.random.normal(k_wv, (feature_dim, embed_dim), dtype=jnp.float32) * 0.1
    bv = jax.random.normal(k_bv, (embed_dim,), dtype=jnp.float32) * 0.1
    Ws = jax.random.normal(k_ws, (lape_dim, embed_dim), dtype=jnp.float32) * 0.1
    bs = jax.random.normal(k_bs, (embed_dim,), dtype=jnp.float32) * 0.1

    pe_table = make_positional_encoding(embed_dim, max_len=100)

    out = data_embedding_forward(x, lap_mx, Wv, bv, Ws, bs, pe_table)
    out = jax.block_until_ready(out)

    ref = reference_forward(x, lap_mx, Wv, bv, Ws, bs, pe_table)
    assert out.shape == (B, T, N, embed_dim)
    assert jnp.allclose(out, ref, atol=1e-5, rtol=1e-5)

    print("KERNEL_OK")
</pallas_src>

<mosaic_0001>
module attributes {stable_mosaic.version = 11 : i64} {
  func.func @_data_embedding_kernel(%arg0: i32, %arg1: i32, %arg2: memref<1x32x16xf32, #tpu.memory_space<vmem>>, %arg3: memref<16x128xf32, #tpu.memory_space<vmem>>, %arg4: memref<32x128xf32, #tpu.memory_space<vmem>>, %arg5: memref<1x32x128xf32, #tpu.memory_space<vmem>>) attributes {dimension_semantics = [#tpu.dimension_semantics<parallel>, #tpu.dimension_semantics<arbitrary>], iteration_bounds = array<i64: 1, 2>, scalar_prefetch = 0 : i64, scratch_operands = 0 : i64, tpu.core_type = #tpu.core_type<tc>, window_params = [{transform_indices = @transform_0, window_bounds = array<i64: 1, 32, 16>}, {pipeline_mode = #tpu.pipeline_mode<synchronous>, transform_indices = @transform_1, window_bounds = array<i64: 16, 128>}, {transform_indices = @transform_2, window_bounds = array<i64: 32, 128>}, {transform_indices = @transform_3, window_bounds = array<i64: 1, 32, 128>}]} {
    %c0 = arith.constant 0 : index
    %c0_0 = arith.constant 0 : index
    %c0_1 = arith.constant 0 : index
    %0 = vector.load %arg2[%c0, %c0_0, %c0_1] : memref<1x32x16xf32, #tpu.memory_space<vmem>>, vector<1x32x16xf32>
    %1 = vector.shape_cast %0 : vector<1x32x16xf32> to vector<32x16xf32>
    %c0_2 = arith.constant 0 : index
    %c0_3 = arith.constant 0 : index
    %2 = vector.load %arg3[%c0_2, %c0_3] : memref<16x128xf32, #tpu.memory_space<vmem>>, vector<16x128xf32>
    %cst = arith.constant dense<0.000000e+00> : vector<32x128xf32>
    %3 = tpu.matmul %1, %2, %cst {dimension_numbers = #tpu.dot_dimension_numbers<[1], [0], [0], [1], [0, 0, 1, 1], [], []>} : vector<32x16xf32>, vector<16x128xf32>, vector<32x128xf32> -> vector<32x128xf32>
    %c0_4 = arith.constant 0 : index
    %c0_5 = arith.constant 0 : index
    %4 = vector.load %arg4[%c0_4, %c0_5] : memref<32x128xf32, #tpu.memory_space<vmem>>, vector<32x128xf32>
    %5 = arith.addf %3, %4 : vector<32x128xf32>
    %c0_6 = arith.constant 0 : index
    %c0_7 = arith.constant 0 : index
    %c0_8 = arith.constant 0 : index
    %6 = vector.load %arg5[%c0_6, %c0_7, %c0_8] : memref<1x32x128xf32, #tpu.memory_space<vmem>>, vector<1x32x128xf32>
    %7 = vector.shape_cast %6 : vector<1x32x128xf32> to vector<32x128xf32>
    %8 = vector.shape_cast %5 : vector<32x128xf32> to vector<1x32x128xf32>
    tpu.vector_store %arg5[%c0_6, %c0_7, %c0_8], %8 {strides = array<i32>} : memref<1x32x128xf32, #tpu.memory_space<vmem>>, vector<1x32x128xf32>,
    return
  }
  func.func @transform_0(%arg0: i32, %arg1: i32) -> (i32, i32, i32) {
    %c0_i32 = arith.constant 0 : i32
    %c0_i32_0 = arith.constant 0 : i32
    return %arg1, %arg0, %c0_i32 : i32, i32, i32
  }
  func.func @transform_1(%arg0: i32, %arg1: i32) -> (i32, i32) {
    %c0_i32 = arith.constant 0 : i32
    %c0_i32_0 = arith.constant 0 : i32
    %c0_i32_1 = arith.constant 0 : i32
    return %c0_i32, %c0_i32_0 : i32, i32
  }
  func.func @transform_2(%arg0: i32, %arg1: i32) -> (i32, i32) {
    %c0_i32 = arith.constant 0 : i32
    %c0_i32_0 = arith.constant 0 : i32
    return %arg0, %c0_i32 : i32, i32
  }
  func.func @transform_3(%arg0: i32, %arg1: i32) -> (i32, i32, i32) {
    %c0_i32 = arith.constant 0 : i32
    %c0_i32_0 = arith.constant 0 : i32
    return %arg1, %arg0, %c0_i32 : i32, i32, i32
  }
}

</mosaic_0001>

<bundles_post_ra>
// kernel: tpu_custom_call.1
= control target key start
LH: loop header
LB: loop body
LE: loop exit
PB: predicated region body
PF: predicated region fallthrough
CT: control target
= control target key end

     0   :  { %8 = vsyncpa [#allocation3], 0  ;;  %s779_s0 = inlined_call_operand.vmem [shape: f32[2,32,16], index: 0, kind: input, shape index: {}]   ;;  %s780_s1 = inlined_call_operand.vmem [shape: f32[16,128], index: 1, kind: input, shape index: {}]   ;;  %s781_s2 = inlined_call_operand.vmem [shape: f32[32,128], index: 2, kind: input, shape index: {}]   ;;  %s782_s3 = inlined_call_operand.hbm [shape: f32[2,32,128], index: 3, kind: output, shape index: {}]  }
   0x1   :  { %10 = vsyncpa [#allocation3 + $0x1], 0  ;;  %s646_s12 = smov 0   ;;  %s648_s13 = smov 0  }
   0x2   :  { %s650_s14 = smov 0   ;;  %s652_s15 = smov 0  }
   0x3   :  { %s654_s16 = smov 0   ;;  %s656_s17 = smov 0  }
   0x4 LB: > { %s444_s18 = sadd.s32 4294967295, %s621_s17   ;;  %s445_s19 = sadd.s32 4294967294, %s621_s17   ;;  %s621_s17 = sphi %s656_s17, %s16_s17   ;;  %s617_s16 = sphi %s654_s16, %s789_s16   ;;  %s613_s15 = sphi %s652_s15, %s788_s15   ;;  %s609_s14 = sphi %s650_s14, %s787_s14   ;;  %s605_s13 = sphi %s648_s13, %s786_s13   ;;  %s601_s12 = sphi %s646_s12, %s785_s12  }
   0x5   : > { %s25_s20 = sadd.s32 1, %s617_s16  ;;  %s112_s21 = sadd.s32 1, %s609_s14 }
   0x6   : > { %p26_p0 = scmp.ge.s32.totalorder %s25_s20, 2  ;;  %p122_p1 = scmp.ne.s32.totalorder %s609_s14, %s605_s13 }
   0x7   : > { %p123_p2 = scmp.eq.s32.totalorder %s444_s18, 1  ;;  %p128_p3 = scmp.ne.s32.totalorder %s605_s13, %s601_s12 }
   0x8   : > { %s791_s20 = smov (%p26_p0, %s25_s20), 0  ;;  %p129_p5 = scmp.eq.s32.totalorder %s445_s19, 1 }
   0x9   : > { %p686_p4 = por %p123_p2, %p122_p1  ;;  %s107_s23 = ssub.s32 %s617_s16, %s791_s20 }
   0xa   : > { %p449_p6 = scmp.ge.s32.totalorder %s621_s17, 1  ;;  %p110_p7 = scmp.eq.s32.totalorder %s107_s23, 0 }
   0xb   : > { %p693_p8 = por %p129_p5, %p128_p3  ;;  %p172_p9 = scmp.lt.s32.totalorder %s621_s17, 3 }
   0xc   : > { %s699_s25 = scalar_select %p110_p7, %s609_s14, %s112_s21  }
   0xd   : > { %p173_p10 = pnand %p449_p6, %p172_p9 }
   0xe   : > { %v226_v0 = vld [vmem:[%s780_s1] sm:$0xff] (!%p173_p10)  ;;  %v227_v1 = vld [vmem:[%s780_s1 + $0x8] sm:$0xff] (!%p173_p10)  ;;  %p206_p11 = scmp.lt.s32.totalorder (!%p173_p10), %s613_s15, 1  ;;  %vm232_vm0 = vcmask (!%p173_p10), 130048   ;;  %s202_s8 = sand.u32 (!%p173_p10), 1, %s605_s13   ;;  %v231_v8 = vld [vmem:[%s781_s2 + $0x18] sm:$0xff] (!%p173_p10) }
   0xf   : > { %176 = sbr.rel (%p173_p10) target bundleno = 258 (0x102), region = 32  ;;  %v480_v2 = vpack.c.bf16 (!%p173_p10), %v227_v1, %v226_v0  ;;  %s450_s9 = sshll.u32 (!%p173_p10), %s202_s8, 5  ;;  %v229_v7 = vld [vmem:[%s781_s2 + $0x8] sm:$0xff] (!%p173_p10)  ;;  %v228_v9 = vld [vmem:[%s781_s2] sm:$0xff] (!%p173_p10)  ;;  %v230_v10 = vld [vmem:[%s781_s2 + $0x10] sm:$0xff] (!%p173_p10) }
  0x10   : > { %s204_s18 = scalar_lea.vmem (!%p173_p10), [#allocation2], %s450_s9  ;;  %s463_s26 = sshll.u32 (!%p173_p10), %s613_s15, 9 }
  0x11   : > { %481 = vmatprep.subr.bf16.mxu0 (!%p173_p10), %v480_v2  ;;  %484 = vmatprep.subr.bf16.mxu1 (!%p173_p10), %v480_v2  ;;  %s350_s19 = sshll.u32 (!%p173_p10), %s204_s18, 4  ;;  %s731_s5 = scalar_lea.hbm (!%p173_p10), %s782_s3, %s463_s26  ;;  %s726_s19 = int_to_ptr.vmem [resolvable:$true] %s350_s19 }
  0x12   : > { %483 = vmatpush3.bf16.msra.mxu0 (!%p173_p10), %v480_v2  ;;  %485 = vmatpush3.bf16.msra.mxu1 (!%p173_p10), %v480_v2  ;;  %s733_s6 = scalar_lea.sflag (!%p173_p10), [#allocation3], %s202_s8  ;;  %s623_s9 = smov (!%p173_p10), [#allocation2]  }
  0x13   : > { %s547_s10 = sshll.u32 (!%p173_p10), %s623_s9, 4  ;;  %s548_s10 = int_to_ptr.vmem [resolvable:$false] %s547_s10 }
  0x14   : > { %s549_s11 = scalar_lea.vmem (!%p173_p10), %s548_s10, 1024  ;;  %p550_p1 = scmp.lt.s32.totalorder (!%p173_p10), %s726_s19, %s548_s10 }
  0x16   : > { %s207_s30 = scalar_select %p206_p11, %s613_s15, 1 }
  0x18   : > { %s462_s4 = sshll.u32 %s207_s30, 5 }
  0x19   : > { %s213_s7 = scalar_lea.vmem %s779_s0, %s462_s4 }
  0x1a   : > { %v222_v3 = vld [vmem:[%s213_s7] sm:$0xff]  ;;  %v224_v4 = vld [vmem:[%s213_s7 + $0x10] sm:$0xff]  ;;  %v223_v5 = vld [vmem:[%s213_s7 + $0x8] sm:$0xff] }
  0x1b   : > { %474 = vmatprep.mubr.msk.f32.mxu0 %vm232_vm0, %v222_v3  ;;  %477 = vmatprep.mubr.msk.f32.mxu1 %vm232_vm0, %v224_v4  ;;  %v225_v6 = vld [vmem:[%s213_s7 + $0x18] sm:$0xff]  ;;  %s543_s7 = scalar_lea.vmem %s726_s19, 512 }
  0x1c   : > { %475 = vmatmul.mubr.msk.f32.vlgmr.msra.gmra.mrb[0].mxu0 %vm232_vm0, %v223_v5  ;;  %478 = vmatmul.mubr.msk.f32.vlgmr.msra.gmra.mrb[0].mxu1 %vm232_vm0, %v225_v6  ;;  %p544_p12 = scmp.ne.s32.totalorder %s726_s19, %s543_s7  ;;  %p551_p2 = scmp.lt.s32.totalorder %s549_s11, %s543_s7 }
  0x1e   : > { %p545_p13 = pnand %p544_p12, %p686_p4  ;;  %p552_p3 = por %p551_p2, %p550_p1 }
  0x20   : > { %p546_p0 = pneg %p545_p13 }
  0x22   : > { %p553_p5 = pnand %p552_p3, %p546_p0 }
  0xef   : > { %v476_v11 = vpop.f32.mrb[0].mxu0  ;;  %v479_v12 = vpop.f32.mrb[0].mxu1 }
  0xf0   : > { %v317_v13 = vadd.f32 %v476_v11, %v229_v7  ;;  %v327_v14 = vadd.f32 %v479_v12, %v231_v8  ;;  %v311_v15 = vpop.f32.mrb[1].mxu0  ;;  %v321_v16 = vpop.f32.mrb[1].mxu1 }
  0xf1   : > { %v312_v17 = vadd.f32 %v311_v15, %v228_v9  ;;  %v322_v18 = vadd.f32 %v321_v16, %v230_v10 }
  0xf2   : > { %331 = vst [vmem:[%s204_s18 + $0x8] sm:$0xff] %v317_v13  ;;  %333 = vst [vmem:[%s204_s18 + $0x18] sm:$0xff] %v327_v14 }
  0xf3   : > { %330 = vst [vmem:[%s204_s18] sm:$0xff] %v312_v17  ;;  %332 = vst [vmem:[%s204_s18 + $0x10] sm:$0xff] %v322_v18 }
  0xf4   : > { %556 = shalt.err (!%p553_p5)
}
  0xf5   : > { %s557_s8 = scalar_lea.hbm %s731_s5, 512  ;;  %s561_s23 = scalar_lea.hbm %s782_s3, 1024 }
  0xf6   : > { %p558_p6 = scmp.ne.s32.totalorder %s731_s5, %s557_s8  ;;  %p562_p10 = scmp.lt.u32.totalorder %s731_s5, %s782_s3 }
  0xf7   : > { %p563_p11 = scmp.lt.u32.totalorder %s561_s23, %s557_s8  ;;  %p565_p13 = scmp.lt.u32.totalorder %s557_s8, %s731_s5 }
  0xf8   : > { %p559_p7 = pnand %p558_p6, %p686_p4 }
  0xf9   : > { %p564_p12 = por %p563_p11, %p562_p10 }
  0xfa   : > { %p560_p9 = pneg %p559_p7 }
  0xfb   : > { %p566_p0 = por %p565_p13, %p564_p12 }
  0xfd   : > { %p567_p1 = pnand %p566_p0, %p560_p9 }
  0xff   : > { %570 = shalt.err (!%p567_p1)
}
 0x100   : > { %s624_s28 = smov 128   ;;  %s625_s29 = smov 8  }
 0x101   : > { %486 = dma.vmem_to_hbm [thread:$0]  (%p686_p4), %s726_s19, 512, %s731_s5, %s733_s6, %s624_s28, %s624_s28, %s625_s29  }
 0x102 PF: > { %p492_p2 = scmp.ge.s32.totalorder %s621_s17, 2  ;;  %s365_s30 = sand.u32 1, %s601_s12  }
 0x103   : > { %s366_s15 = scalar_lea.sflag [#allocation3], %s365_s30 }
 0x104   : > { %p489_p3 = pnand %p492_p2, %p693_p8 }
 0x106   : > { %596 = dma.done.wait (!%p489_p3), %s366_s15, 512  }
 0x107   : > { %598 = vsyncadd (!%p489_p3), %s366_s15, 4294966784  ;;  %s16_s17 = sadd.s32 1, %s621_s17   ;;  %s785_s12 = smov %s605_s13 }
 0x108   : > { %p13_p5 = scmp.ge.s32.totalorder %s16_s17, 4   ;;  %s786_s13 = smov %s609_s14 }
 0x109   : > { %s787_s14 = smov %s699_s25  ;;  %s788_s15 = smov %s617_s16 }
 0x10a   : > { %s789_s16 = smov %s791_s20  ;;  %15 = sbr.rel (!%p13_p5) target bundleno = 4 (0x4), region = 70 }
 0x111   :  { %371 = vsyncpa [#allocation3], 1 }
 0x112   :  { %373 = vsyncpa [#allocation3 + $0x1], 1 }

</bundles_post_ra>
